<compile_context>
chip_gen: v7x
topology: tpu7x:2x2x1
jax: 0.10.0
libtpu: 0.0.40
codegen_flags: <defaults>
</compile_context>

<pallas_src>
import functools
import math

import jax
import jax.numpy as jnp
from jax import lax
from jax.experimental import pallas as pl
from jax.experimental.pallas import tpu as pltpu

LANES = 128
SUBLANES = 8


def _round_up(v, m):
    return ((v + m - 1) // m) * m


def _device_kind() -> str:
    try:
        return jax.devices()[0].device_kind.lower()
    except Exception:  # pragma: no cover - defensive; fall back to safe config
        return ""


def _charbonnier_kernel(x_ref, y_ref, o_ref, acc_ref, *, eps2, rows,
                        tile_rows, acc_rows, tiles_per_core, needs_mask):
    c = pl.program_id(0)   # core-block axis (CORE_PARALLEL on v7x, size 1 otherwise)
    i = pl.program_id(1)   # reduction axis ("arbitrary")

    @pl.when(i == 0)
    def _():
        acc_ref[...] = jnp.zeros_like(acc_ref)

    xd = x_ref[...].astype(jnp.float32)
    yd = y_ref[...].astype(jnp.float32)
    d = xd - yd
    val = jnp.sqrt(d * d + eps2)                      # (tile_rows, LANES)

    n_chunks = tile_rows // acc_rows

    def _partial(v):
        # Tile-aligned regrouping of sublane blocks; the axis-0 reduction is
        # acc_rows//8 independent vreg-add chains -> VALU slots stay fed.
        if n_chunks == 1:
            return v
        return v.reshape(n_chunks, acc_rows, LANES).sum(axis=0)

    if needs_mask:
        # rows remaining in the logical slab starting at this tile.
        rem = rows - (c * tiles_per_core + i) * tile_rows

        @pl.when(rem >= tile_rows)
        def _():
            # Steady-state path: no iota / compare / select.
            acc_ref[...] += _partial(val)

        @pl.when(rem < tile_rows)
        def _():
            # Ragged last tile or phantom tile: zero rows past the end
            # (garbage in the padded partial block may be NaN; the select
            # still yields 0).
            row = lax.broadcasted_iota(jnp.int32, val.shape, 0)
            acc_ref[...] += _partial(jnp.where(row < rem, val, 0.0))
    else:
        acc_ref[...] += _partial(val)

    @pl.when(i == pl.num_programs(1) - 1)
    def _():
        o_ref[...] = acc_ref[...]


def _get_outnorm(shape, out_norm: str = '') -> float:
    """Matches get_outnorm() from the PyTorch module (assumes NCHW for 'c')."""
    if not out_norm:
        return 1.0
    norm = 1.0
    if 'b' in out_norm:
        norm /= shape[0]
    if 'c' in out_norm:
        # Same assumption as the PyTorch reference: input is at least 3-D NCHW.
        norm /= shape[-3]
    if 'i' in out_norm:
        norm /= shape[-1] * shape[-2]
    return norm


def charbonnier_loss(x, y, eps: float = 1e-6, out_norm: str = 'bci'):
    """Pallas implementation of CharbonnierLoss.forward (x, y are NCHW)."""
    assert x.shape == y.shape
    norm = _get_outnorm(x.shape, out_norm)
    eps2 = float(eps) ** 2
    total = math.prod(x.shape)

    xf = x.reshape(-1)
    yf = y.reshape(-1)

    # Lane-aligned prefix goes through the kernel; tiny tail handled here
    # (avoids materializing padded copies of both full arrays in HBM).
    aligned = (total // LANES) * LANES
    if aligned != total:
        xt = xf[aligned:].astype(jnp.float32)
        yt = yf[aligned:].astype(jnp.float32)
        dt = xt - yt
        tail_sum = jnp.sum(jnp.sqrt(dt * dt + eps2))
        xf = xf[:aligned]
        yf = yf[:aligned]
    else:
        tail_sum = None

    if aligned == 0:
        return tail_sum * norm

    rows = aligned // LANES
    x2d = xf.reshape(rows, LANES)
    y2d = yf.reshape(rows, LANES)

    # Generation-aware configuration.
    kind = _device_kind()
    is_v7 = "v7" in kind
    is_v5 = "v5" in kind
    max_tile_rows = 4096 if is_v5 else 8192        # 2 MiB vs 4 MiB f32 blocks
    num_core_blocks = 2 if is_v7 else 1            # split across 2 TCs on v7x only

    tile_rows = min(max_tile_rows, _round_up(rows, SUBLANES))

    # Widest accumulator (<= 64 sublane rows) that evenly divides the tile.
    acc_rows = SUBLANES
    for cand in (64, 32, 16):
        if tile_rows % cand == 0:
            acc_rows = cand
            break

    n_tiles = pl.cdiv(rows, tile_rows)
    tiles_per_core = pl.cdiv(n_tiles, num_core_blocks)
    needs_mask = (num_core_blocks * tiles_per_core * tile_rows != rows)

    if num_core_blocks * tiles_per_core == n_tiles:
        def in_map(c, i):
            return (c * tiles_per_core + i, 0)
    else:
        # Phantom trailing tiles on the last core-block: clamp the block index
        # (their contribution is zeroed by the row mask in the kernel).
        last_tile = n_tiles - 1

        def in_map(c, i):
            return (jnp.minimum(c * tiles_per_core + i, last_tile), 0)

    kernel = functools.partial(
        _charbonnier_kernel,
        eps2=eps2,
        rows=rows,
        tile_rows=tile_rows,
        acc_rows=acc_rows,
        tiles_per_core=tiles_per_core,
        needs_mask=needs_mask,
    )

    if is_v7 and num_core_blocks == 2:
        dims = (pltpu.CORE_PARALLEL, "arbitrary")
    else:
        dims = ("parallel", "arbitrary")

    # 2 inputs x 2 pipeline buffers x tile bytes, plus generous headroom for
    # output / accumulator / internal scratch.  Stays within v5e's 16 MiB
    # scoped default only by explicit override, and well under v7x's 64 MiB.
    itemsize = jnp.dtype(x.dtype).itemsize
    tile_bytes = tile_rows * LANES * itemsize
    vmem_limit = int(4 * tile_bytes + (8 << 20))

    partials = pl.pallas_call(
        kernel,
        out_shape=jax.ShapeDtypeStruct(
            (num_core_blocks * acc_rows, LANES), jnp.float32),
        grid_spec=pltpu.PrefetchScalarGridSpec(
            num_scalar_prefetch=0,
            grid=(num_core_blocks, tiles_per_core),
            in_specs=[
                pl.BlockSpec((tile_rows, LANES), in_map),
                pl.BlockSpec((tile_rows, LANES), in_map),
            ],
            out_specs=pl.BlockSpec((acc_rows, LANES), lambda c, i: (c, 0)),
            scratch_shapes=[pltpu.VMEM((acc_rows, LANES), jnp.float32)],
        ),
        compiler_params=pltpu.CompilerParams(
            dimension_semantics=dims,
            vmem_limit_bytes=vmem_limit),
    )(x2d, y2d)

    loss_sum = jnp.sum(partials)
    if tail_sum is not None:
        loss_sum = loss_sum + tail_sum
    return loss_sum * norm


if __name__ == "__main__":
    key = jax.random.PRNGKey(0)
    kx, ky = jax.random.split(key)
    B, C, H, W = 2, 4, 16, 16  # NCHW, matching the PyTorch module's usage
    x = jax.random.normal(kx, (B, C, H, W), dtype=jnp.float32)
    y = jax.random.normal(ky, (B, C, H, W), dtype=jnp.float32)

    loss = charbonnier_loss(x, y, eps=1e-6, out_norm='bci')
    loss = jax.block_until_ready(loss)

    # Pure-JAX reference check.
    ref = jnp.sum(jnp.sqrt((x - y) ** 2 + 1e-6 ** 2)) / (B * C * H * W)
    assert jnp.allclose(loss, ref, rtol=1e-5, atol=1e-5), (loss, ref)

    print("KERNEL_OK")
</pallas_src>

<mosaic_0001>
module attributes {stable_mosaic.version = 11 : i64} {
  func.func @_charbonnier_kernel(%arg0: i32, %arg1: i32, %arg2: memref<16x128xf32, #tpu.memory_space<vmem>>, %arg3: memref<16x128xf32, #tpu.memory_space<vmem>>, %arg4: memref<16x128xf32, #tpu.memory_space<vmem>>, %arg5: memref<16x128xf32, #tpu.memory_space<vmem>>) attributes {dimension_semantics = [#tpu.dimension_semantics<parallel>, #tpu.dimension_semantics<arbitrary>], iteration_bounds = array<i64: 1, 1>, scalar_prefetch = 0 : i64, scratch_operands = 1 : i64, tpu.core_type = #tpu.core_type<tc>, window_params = [{transform_indices = @transform_0, window_bounds = array<i64: 16, 128>}, {transform_indices = @transform_1, window_bounds = array<i64: 16, 128>}, {transform_indices = @transform_2, window_bounds = array<i64: 16, 128>}]} {
    %c0_i32 = arith.constant 0 : i32
    %0 = arith.cmpi eq, %arg1, %c0_i32 : i32
    %1 = arith.extui %0 : i1 to i32
    %c0_i32_0 = arith.constant 0 : i32
    %2 = arith.cmpi ne, %1, %c0_i32_0 : i32
    scf.if %2 {
      %cst_10 = arith.constant 0.000000e+00 : f32
      %16 = vector.broadcast %cst_10 : f32 to vector<16x128xf32>
      %c0_11 = arith.constant 0 : index
      %c0_12 = arith.constant 0 : index
      %17 = vector.load %arg5[%c0_11, %c0_12] : memref<16x128xf32, #tpu.memory_space<vmem>>, vector<16x128xf32>
      tpu.vector_store %arg5[%c0_11, %c0_12], %16 {strides = array<i32>} : memref<16x128xf32, #tpu.memory_space<vmem>>, vector<16x128xf32>,
    } else {
    }
    %c0 = arith.constant 0 : index
    %c0_1 = arith.constant 0 : index
    %3 = vector.load %arg2[%c0, %c0_1] : memref<16x128xf32, #tpu.memory_space<vmem>>, vector<16x128xf32>
    %c0_2 = arith.constant 0 : index
    %c0_3 = arith.constant 0 : index
    %4 = vector.load %arg3[%c0_2, %c0_3] : memref<16x128xf32, #tpu.memory_space<vmem>>, vector<16x128xf32>
    %5 = arith.subf %3, %4 : vector<16x128xf32>
    %6 = arith.mulf %5, %5 : vector<16x128xf32>
    %cst = arith.constant 9.99999996E-13 : f32
    %7 = vector.broadcast %cst : f32 to vector<16x128xf32>
    %8 = arith.addf %6, %7 : vector<16x128xf32>
    %9 = math.sqrt %8 : vector<16x128xf32>
    %c0_4 = arith.constant 0 : index
    %c0_5 = arith.constant 0 : index
    %10 = vector.load %arg5[%c0_4, %c0_5] : memref<16x128xf32, #tpu.memory_space<vmem>>, vector<16x128xf32>
    %11 = arith.addf %10, %9 : vector<16x128xf32>
    %c0_6 = arith.constant 0 : index
    %c0_7 = arith.constant 0 : index
    %12 = vector.load %arg5[%c0_6, %c0_7] : memref<16x128xf32, #tpu.memory_space<vmem>>, vector<16x128xf32>
    tpu.vector_store %arg5[%c0_6, %c0_7], %11 {strides = array<i32>} : memref<16x128xf32, #tpu.memory_space<vmem>>, vector<16x128xf32>,
    %c0_i32_8 = arith.constant 0 : i32
    %13 = arith.cmpi eq, %arg1, %c0_i32_8 : i32
    %14 = arith.extui %13 : i1 to i32
    %c0_i32_9 = arith.constant 0 : i32
    %15 = arith.cmpi ne, %14, %c0_i32_9 : i32
    scf.if %15 {
      %c0_10 = arith.constant 0 : index
      %c0_11 = arith.constant 0 : index
      %16 = vector.load %arg5[%c0_10, %c0_11] : memref<16x128xf32, #tpu.memory_space<vmem>>, vector<16x128xf32>
      %c0_12 = arith.constant 0 : index
      %c0_13 = arith.constant 0 : index
      %17 = vector.load %arg4[%c0_12, %c0_13] : memref<16x128xf32, #tpu.memory_space<vmem>>, vector<16x128xf32>
      tpu.vector_store %arg4[%c0_12, %c0_13], %16 {strides = array<i32>} : memref<16x128xf32, #tpu.memory_space<vmem>>, vector<16x128xf32>,
    } else {
    }
    return
  }
  func.func @transform_0(%arg0: i32, %arg1: i32) -> (i32, i32) {
    %c1_i32 = arith.constant 1 : i32
    %0 = arith.muli %arg0, %c1_i32 : i32
    %1 = arith.addi %0, %arg1 : i32
    %c0_i32 = arith.constant 0 : i32
    %c0_i32_0 = arith.constant 0 : i32
    return %1, %c0_i32 : i32, i32
  }
  func.func @transform_1(%arg0: i32, %arg1: i32) -> (i32, i32) {
    %c1_i32 = arith.constant 1 : i32
    %0 = arith.muli %arg0, %c1_i32 : i32
    %1 = arith.addi %0, %arg1 : i32
    %c0_i32 = arith.constant 0 : i32
    %c0_i32_0 = arith.constant 0 : i32
    return %1, %c0_i32 : i32, i32
  }
  func.func @transform_2(%arg0: i32, %arg1: i32) -> (i32, i32) {
    %c0_i32 = arith.constant 0 : i32
    %c0_i32_0 = arith.constant 0 : i32
    return %arg0, %c0_i32 : i32, i32
  }
}

</mosaic_0001>

<bundles_post_ra>
// kernel: tpu_custom_call.1
= control target key start
LH: loop header
LB: loop body
LE: loop exit
PB: predicated region body
PF: predicated region fallthrough
CT: control target
= control target key end

     0   :  { %7 = vsyncpa [#allocation4], 0  ;;  %s259_s0 = inlined_call_operand.hbm [shape: f32[16,128], index: 0, kind: input, shape index: {}]   ;;  %s260_s1 = inlined_call_operand.hbm [shape: f32[16,128], index: 1, kind: input, shape index: {}]   ;;  %s261_s2 = inlined_call_operand.hbm [shape: f32[16,128], index: 2, kind: output, shape index: {}]  }
   0x1   :  { %8 = vsyncpa [#allocation7], 0 }
   0x2   :  { %9 = vsyncpa [#allocation5], 0  ;;  %s194_s9 = smov [#allocation3]   ;;  %s122_s13 = scalar_lea.hbm %s259_s0, 256 }
   0x3   :  { %s19_s10 = sshll.u32 %s194_s9, 4  ;;  %p123_p0 = scmp.ne.s32.totalorder %s259_s0, %s122_s13  ;;  %s20_s10 = int_to_ptr.vmem [resolvable:$true] %s19_s10 }
   0x4   :  { %p126_p1 = scmp.lt.u32.totalorder %s122_s13, %s259_s0 }
   0x6   :  { %p128_p2 = pnand %p126_p1, %p123_p0 }
   0x8   :  { %131 = shalt.err (!%p128_p2)
}
   0x9   :  { %s132_s18 = scalar_lea.vmem %s20_s10, 256  ;;  %p137_p4 = scmp.lt.s32.totalorder %s20_s10, %s20_s10 }
   0xa   :  { %p133_p3 = scmp.ne.s32.totalorder %s20_s10, %s132_s18  ;;  %p138_p5 = scmp.lt.s32.totalorder %s132_s18, %s132_s18 }
   0xc   :  { %p139_p6 = por %p138_p5, %p137_p4 }
   0xe   :  { %p140_p7 = pnand %p139_p6, %p133_p3 }
  0x10   :  { %143 = shalt.err (!%p140_p7)
}
  0x11   :  { %s195_s19 = smov 128   ;;  %s196_s20 = smov 8  }
  0x12   :  { %25 = dma.hbm_to_vmem [thread:$0]  %s259_s0, 256, %s20_s10, [#allocation4], %s195_s19, %s195_s19, %s196_s20  }
  0x13   :  { %s197_s23 = smov [#allocation6]   ;;  %s144_s27 = scalar_lea.hbm %s260_s1, 256 }
  0x14   :  { %s35_s24 = sshll.u32 %s197_s23, 4  ;;  %p145_p8 = scmp.ne.s32.totalorder %s260_s1, %s144_s27  ;;  %s36_s24 = int_to_ptr.vmem [resolvable:$true] %s35_s24 }
  0x15   :  { %p148_p9 = scmp.lt.u32.totalorder %s144_s27, %s260_s1 }
  0x17   :  { %p150_p10 = pnand %p148_p9, %p145_p8 }
  0x19   :  { %153 = shalt.err (!%p150_p10)
}
  0x1a   :  { %s154_s4 = scalar_lea.vmem %s36_s24, 256  ;;  %p159_p12 = scmp.lt.s32.totalorder %s36_s24, %s36_s24 }
  0x1b   :  { %p155_p11 = scmp.ne.s32.totalorder %s36_s24, %s154_s4  ;;  %p160_p13 = scmp.lt.s32.totalorder %s154_s4, %s154_s4 }
  0x1d   :  { %p161_p0 = por %p160_p13, %p159_p12 }
  0x1f   :  { %p162_p1 = pnand %p161_p0, %p155_p11 }
  0x21   :  { %165 = shalt.err (!%p162_p1)
}
  0x22   :  { %41 = dma.hbm_to_vmem [thread:$0]  %s260_s1, 256, %s36_s24, [#allocation7], %s195_s19, %s195_s19, %s196_s20  }
  0x23   :  { %188 = dma.done.wait [#allocation4], 256  }
  0x24   :  { %189 = vsyncadd [#allocation4], 4294967040 }
  0x25   :  { %190 = dma.done.wait [#allocation7], 256  }
  0x26   :  { %191 = vsyncadd [#allocation7], 4294967040  ;;  %v58_v0 = vld [vmem:[#allocation3] sm:$0xff]  ;;  %v60_v1 = vld [vmem:[#allocation6] sm:$0xff]  ;;  %s198_s1 = smov [#allocation8]  }
  0x27   :  { %v59_v2 = vld [vmem:[#allocation3 + $0x8] sm:$0xff]  ;;  %v62_v3 = vsub.f32 %v58_v0, %v60_v1  ;;  %v61_v4 = vld [vmem:[#allocation6 + $0x8] sm:$0xff]  ;;  %s100_s6 = sshll.u32 %s198_s1, 4  ;;  %s101_s6 = int_to_ptr.vmem [resolvable:$true] %s100_s6 }
  0x28   :  { %v63_v5 = vsub.f32 %v59_v2, %v61_v4  ;;  %s166_s7 = scalar_lea.vmem %s101_s6, 256  ;;  %p171_p3 = scmp.lt.s32.totalorder %s101_s6, %s101_s6 }
  0x29   :  { %v64_v6 = vmul.f32 %v62_v3, %v62_v3  ;;  %p167_p2 = scmp.ne.s32.totalorder %s101_s6, %s166_s7  ;;  %p172_p4 = scmp.lt.s32.totalorder %s166_s7, %s166_s7 }
  0x2a   :  { %v65_v7 = vmul.f32 %v63_v5, %v63_v5 }
  0x2b   :  { %v66_v8 = vadd.f32 1e-12, %v64_v6  ;;  %p173_p5 = por %p172_p4, %p171_p3 }
  0x2c   :  { %v67_v9 = vadd.f32 1e-12, %v65_v7 }
  0x2d   :  { %118 = vrsqrt.f32 %v66_v8  ;;  %vm70_vm0 = vcmp.eq.f32.partialorder %v66_v8, inf  ;;  %v73_v11 = vand.u32 2147483648, %v66_v8  ;;  %vm72_vm1 = vcmp.eq.f32.partialorder %v66_v8, 0.0  ;;  %p174_p6 = pnand %p173_p5, %p167_p2 }
  0x2e   :  { %120 = vrsqrt.f32 %v67_v9  ;;  %vm77_vm2 = vcmp.eq.f32.partialorder %v67_v9, inf  ;;  %v80_v14 = vand.u32 2147483648, %v67_v9  ;;  %vm79_vm3 = vcmp.eq.f32.partialorder %v67_v9, 0.0 }
  0x37   :  { %v119_v10 = vpop.eup %118 }
  0x38   :  { %v121_v12 = vpop.eup %120  ;;  %v69_v13 = vmul.f32 %v119_v10, %v66_v8 }
  0x39   :  { %v76_v15 = vmul.f32 %v121_v12, %v67_v9 }
  0x3a   :  { %v71_v16 = vsel %vm70_vm0, %v66_v8, %v69_v13 }
  0x3b   :  { %v74_v17 = vsel %vm72_vm1, %v73_v11, %v71_v16  ;;  %v78_v18 = vsel %vm77_vm2, %v67_v9, %v76_v15 }
  0x3c   :  { %93 = vst [vmem:[#allocation8] sm:$0xff] %v74_v17  ;;  %v81_v19 = vsel %vm79_vm3, %v80_v14, %v78_v18 }
  0x3d   :  { %94 = vst [vmem:[#allocation8 + $0x8] sm:$0xff] %v81_v19 }
  0x3e   :  { %177 = shalt.err (!%p174_p6)
}
  0x3f   :  { %s178_s10 = scalar_lea.hbm %s261_s2, 256 }
  0x40   :  { %p179_p7 = scmp.ne.s32.totalorder %s261_s2, %s178_s10  ;;  %p182_p8 = scmp.lt.u32.totalorder %s178_s10, %s261_s2 }
  0x42   :  { %p184_p9 = pnand %p182_p8, %p179_p7 }
  0x44   :  { %187 = shalt.err (!%p184_p9)
}
  0x45   :  { %106 = dma.vmem_to_hbm [thread:$0]  %s101_s6, 256, %s261_s2, [#allocation5], %s195_s19, %s195_s19, %s196_s20  }
  0x46   :  { %192 = dma.done.wait [#allocation5], 256  }
  0x47   :  { %193 = vsyncadd [#allocation5], 4294967040 }
  0x48   :  { %110 = vsyncpa [#allocation4], 1 }
  0x49   :  { %111 = vsyncpa [#allocation7], 1 }
  0x4a   :  { %112 = vsyncpa [#allocation5], 1 }

</bundles_post_ra>
